<compile_context>
chip_gen: v7x
topology: tpu7x:2x2x1
jax: 0.10.0
libtpu: 0.0.40
codegen_flags: <defaults>
</compile_context>

<pallas_src>
from functools import partial

import jax
import jax.numpy as jnp
from jax import lax
from jax.experimental import pallas as pl
from jax.experimental.pallas import tpu as pltpu


def _attention_block_kernel(g_ref, x_ref, pg_ref, px_ref, out_ref, *, cg, cx):
    """One (batch-block, pixel-tile) step of the attention gate, channels-first.

    g_ref:   (Bblk, Cg, T)   gate-signal pixels (pixels on the lane axis)
    x_ref:   (Bblk, Cx, T)   skip-connection pixels
    pg_ref:  (Cout, Cg + 2)  packed [ BN-folded W_g | BN_g shift | PReLU alpha ]
    px_ref:  (Cout, Cx + 3)  packed [ BN-folded W_x | BN_x shift | folded psi weight | BN_psi shift ]
    out_ref: (Bblk, Cout, T)
    """
    pg = pg_ref[...]
    px = px_ref[...]
    wg = pg[:, :cg]                    # (Cout, Cg)  lane offset 0 -> clean MXU operand
    bg = pg[:, cg:cg + 1]              # (Cout, 1)
    alpha = pg[:, cg + 1:cg + 2]       # (Cout, 1)
    wx = px[:, :cx]                    # (Cout, Cx)
    bx = px[:, cx:cx + 1]              # (Cout, 1)
    wpsi = px[:, cx + 1:cx + 2]        # (Cout, 1)
    bpsi = px[0:1, cx + 2:cx + 3]      # (1, 1)

    # Static unroll over the (small) batch block packed into this grid step.
    for b in range(g_ref.shape[0]):
        g = g_ref[b].astype(jnp.float32)       # (Cg, T)
        x = x_ref[b].astype(jnp.float32)       # (Cx, T)

        # 1x1 convs == tiny channel matmuls on the MXU; BN folded into weight/bias.
        gp = jnp.dot(wg, g, preferred_element_type=jnp.float32) + bg
        xp = jnp.dot(wx, x, preferred_element_type=jnp.float32) + bx

        # psi branch: PReLU -> 1x1 conv to 1 channel (weighted sublane reduce) -> BN -> sigmoid.
        s = gp + xp
        pre = jnp.where(s >= 0.0, s, alpha * s)
        psi = jnp.sum(pre * wpsi, axis=0, keepdims=True) + bpsi     # (1, T)
        psi = jax.nn.sigmoid(psi)

        # Gated output: BN(W_x(x)) * psi (matches the PyTorch forward: x = W_x(x); x * psi).
        out_ref[b] = (xp * psi).astype(out_ref.dtype)


def _largest_divisor_leq(n, k):
    k = max(1, min(n, k))
    while n % k:
        k -= 1
    return k


def attention_block(g, x, params, *, pixels_per_step=32768, max_batch_block=8,
                    out_dtype=None):
    """g: (N, Cg, H, W), x: (N, Cx, H, W)  (PyTorch NCHW).  Returns (N, Cout, H, W)."""
    N, Cg, H, W = g.shape
    _, Cx, _, _ = x.shape
    Cout = params["wg"].shape[0]
    HW = H * W
    if out_dtype is None:
        out_dtype = x.dtype

    # ---- Tiling: large lane-dense pixel tiles; batch-block when the image is small. ----
    LANE = 128
    hw_ceil = -(-HW // LANE) * LANE
    target = max(LANE, (pixels_per_step // LANE) * LANE)
    if hw_ceil >= target:
        tile = target                       # multiple of 128; ragged tail handled by Pallas
        bblk = 1
    else:
        tile = HW                           # single full-extent pixel block per batch row
        want = max(1, target // hw_ceil)
        bblk = _largest_divisor_leq(N, min(max_batch_block, want))
    n_tiles = pl.cdiv(HW, tile)
    # Keep >= 2 grid steps when possible so v7x's 2 TensorCores both get work.
    while bblk > 1 and (N // bblk) * n_tiles < 2:
        bblk = _largest_divisor_leq(N, bblk - 1)
    grid = (N // bblk, n_tiles)

    # NCHW is already channel-major: flatten H*W (free reshape), no pad, no transpose.
    g3 = g.reshape(N, Cg, HW)
    x3 = x.reshape(N, Cx, HW)

    f32 = jnp.float32
    # Fold BatchNorm (inference mode) into the conv weights / per-channel biases,
    # then pack into two small parameter blocks (weights first -> lane offset 0).
    wg_f = (params["g_scale"][:, None] * params["wg"]).astype(f32)             # (Cout, Cg)
    wx_f = (params["x_scale"][:, None] * params["wx"]).astype(f32)             # (Cout, Cx)
    wpsi_f = (params["psi_scale"][0] * params["wpsi"]).reshape(Cout, 1).astype(f32)
    bg = params["g_shift"].reshape(Cout, 1).astype(f32)
    bx = params["x_shift"].reshape(Cout, 1).astype(f32)
    alpha = params["alpha"].reshape(Cout, 1).astype(f32)
    bpsi = jnp.broadcast_to(params["psi_shift"].reshape(1, 1).astype(f32), (Cout, 1))

    par_g = jnp.concatenate([wg_f, bg, alpha], axis=1)             # (Cout, Cg + 2)
    par_x = jnp.concatenate([wx_f, bx, wpsi_f, bpsi], axis=1)      # (Cout, Cx + 3)

    kernel = partial(_attention_block_kernel, cg=Cg, cx=Cx)

    out3 = pl.pallas_call(
        kernel,
        out_shape=jax.ShapeDtypeStruct((N, Cout, HW), out_dtype),
        grid=grid,
        in_specs=[
            pl.BlockSpec((bblk, Cg, tile), lambda b, t: (b, 0, t)),     # g pixels
            pl.BlockSpec((bblk, Cx, tile), lambda b, t: (b, 0, t)),     # x pixels
            pl.BlockSpec((Cout, Cg + 2), lambda b, t: (0, 0)),          # packed g-branch params
            pl.BlockSpec((Cout, Cx + 3), lambda b, t: (0, 0)),          # packed x/psi-branch params
        ],
        out_specs=pl.BlockSpec((bblk, Cout, tile), lambda b, t: (b, 0, t)),
        compiler_params=pltpu.CompilerParams(
            dimension_semantics=("parallel", "parallel"),
            vmem_limit_bytes=32 * 1024 * 1024),
    )(g3, x3, par_g, par_x)

    return out3.reshape(N, Cout, H, W)


def make_params(key, cg, cx, cout, eps=1e-5):
    """Deterministic synthetic parameters matching the PyTorch module shapes."""
    ks = jax.random.split(key, 15)

    # Conv2d weights: PyTorch shape (Cout, Cin, 1, 1) -> stored as (Cout, Cin).
    wg = 0.2 * jax.random.normal(ks[0], (cout, cg), jnp.float32)
    wx = 0.2 * jax.random.normal(ks[1], (cout, cx), jnp.float32)
    wpsi = 0.2 * jax.random.normal(ks[2], (1, cout), jnp.float32)

    def bn_fold(kg, kb, km, kv, c):
        gamma = 1.0 + 0.1 * jax.random.normal(kg, (c,))
        beta = 0.1 * jax.random.normal(kb, (c,))
        mean = 0.1 * jax.random.normal(km, (c,))
        var = jnp.abs(jax.random.normal(kv, (c,))) + 0.5
        scale = gamma / jnp.sqrt(var + eps)
        shift = beta - mean * scale
        return scale.astype(jnp.float32), shift.astype(jnp.float32)

    g_scale, g_shift = bn_fold(ks[3], ks[4], ks[5], ks[6], cout)
    x_scale, x_shift = bn_fold(ks[7], ks[8], ks[9], ks[10], cout)
    p_scale, p_shift = bn_fold(ks[11], ks[12], ks[13], ks[14], 1)

    alpha = jnp.full((cout,), 0.25, jnp.float32)   # PReLU default init (per-channel)

    return {"wg": wg, "wx": wx, "wpsi": wpsi,
            "g_scale": g_scale, "g_shift": g_shift,
            "x_scale": x_scale, "x_shift": x_shift,
            "psi_scale": p_scale, "psi_shift": p_shift,
            "alpha": alpha}


def attention_block_ref(g, x, params):
    """Plain-JAX reference (same math, NCHW) for verification."""
    hp = lax.Precision.HIGHEST
    gp = jnp.einsum('oc,nchw->nohw', params["wg"], g, precision=hp)
    gp = gp * params["g_scale"][None, :, None, None] + params["g_shift"][None, :, None, None]
    xp = jnp.einsum('oc,nchw->nohw', params["wx"], x, precision=hp)
    xp = xp * params["x_scale"][None, :, None, None] + params["x_shift"][None, :, None, None]
    s = gp + xp
    pre = jnp.where(s >= 0.0, s, params["alpha"][None, :, None, None] * s)
    psi = jnp.einsum('oc,nchw->nohw', params["wpsi"], pre, precision=hp)
    psi = psi * params["psi_scale"][0] + params["psi_shift"][0]
    psi = jax.nn.sigmoid(psi)
    return xp * psi


if __name__ == "__main__":
    key = jax.random.PRNGKey(0)

    def run_case(case_key, n, cg, cx, cout, h, w, **kw):
        kg, kx, kp = jax.random.split(case_key, 3)
        g = jax.random.normal(kg, (n, cg, h, w), dtype=jnp.float32)
        x = jax.random.normal(kx, (n, cx, h, w), dtype=jnp.float32)
        params = make_params(kp, cg, cx, cout)
        out = jax.block_until_ready(attention_block(g, x, params, **kw))
        ref = attention_block_ref(g, x, params)
        assert out.shape == ref.shape
        err = jnp.max(jnp.abs(out - ref))
        assert jnp.allclose(out, ref, atol=2e-4, rtol=2e-4), f"Pallas mismatch, max err {err}"

    k1, k2, k3 = jax.random.split(key, 3)
    # 1) Main case: the module at small UNet-like shapes (single full-image pixel tile).
    run_case(k1, n=2, cg=6, cx=4, cout=8, h=16, w=16)
    # 2) Ragged pixel-tile path: HW=400 split into 256 + partial 144, no host pad/slice.
    run_case(k2, n=1, cg=5, cx=3, cout=4, h=20, w=20, pixels_per_step=256)
    # 3) Batch-blocked path for tiny images (2 batch rows packed per grid step).
    run_case(k3, n=4, cg=6, cx=4, cout=8, h=8, w=8)

    print("KERNEL_OK")
</pallas_src>

<mosaic_0001>
module attributes {stable_mosaic.version = 11 : i64} {
  func.func @_attention_block_kernel(%arg0: i32, %arg1: i32, %arg2: memref<1x6x256xf32, #tpu.memory_space<vmem>>, %arg3: memref<1x4x256xf32, #tpu.memory_space<vmem>>, %arg4: memref<8x8xf32, #tpu.memory_space<vmem>>, %arg5: memref<8x7xf32, #tpu.memory_space<vmem>>, %arg6: memref<1x8x256xf32, #tpu.memory_space<vmem>>) attributes {dimension_semantics = [#tpu.dimension_semantics<parallel>, #tpu.dimension_semantics<parallel>], iteration_bounds = array<i64: 2, 1>, scalar_prefetch = 0 : i64, scratch_operands = 0 : i64, tpu.core_type = #tpu.core_type<tc>, window_params = [{transform_indices = @transform_0, window_bounds = array<i64: 1, 6, 256>}, {transform_indices = @transform_1, window_bounds = array<i64: 1, 4, 256>}, {pipeline_mode = #tpu.pipeline_mode<synchronous>, transform_indices = @transform_2, window_bounds = array<i64: 8, 8>}, {pipeline_mode = #tpu.pipeline_mode<synchronous>, transform_indices = @transform_3, window_bounds = array<i64: 8, 7>}, {transform_indices = @transform_4, window_bounds = array<i64: 1, 8, 256>}]} {
    %c0 = arith.constant 0 : index
    %c0_0 = arith.constant 0 : index
    %0 = vector.load %arg4[%c0, %c0_0] : memref<8x8xf32, #tpu.memory_space<vmem>>, vector<8x8xf32>
    %c0_1 = arith.constant 0 : index
    %c0_2 = arith.constant 0 : index
    %1 = vector.load %arg5[%c0_1, %c0_2] : memref<8x7xf32, #tpu.memory_space<vmem>>, vector<8x7xf32>
    %2 = vector.extract_strided_slice %0 {offsets = [0, 0], sizes = [8, 6], strides = [1, 1]} : vector<8x8xf32> to vector<8x6xf32>
    %3 = vector.extract_strided_slice %0 {offsets = [0, 6], sizes = [8, 1], strides = [1, 1]} : vector<8x8xf32> to vector<8x1xf32>
    %4 = vector.extract_strided_slice %0 {offsets = [0, 7], sizes = [8, 1], strides = [1, 1]} : vector<8x8xf32> to vector<8x1xf32>
    %5 = vector.extract_strided_slice %1 {offsets = [0, 0], sizes = [8, 4], strides = [1, 1]} : vector<8x7xf32> to vector<8x4xf32>
    %6 = vector.extract_strided_slice %1 {offsets = [0, 4], sizes = [8, 1], strides = [1, 1]} : vector<8x7xf32> to vector<8x1xf32>
    %7 = vector.extract_strided_slice %1 {offsets = [0, 5], sizes = [8, 1], strides = [1, 1]} : vector<8x7xf32> to vector<8x1xf32>
    %8 = vector.extract_strided_slice %1 {offsets = [0, 6], sizes = [1, 1], strides = [1, 1]} : vector<8x7xf32> to vector<1x1xf32>
    %c0_3 = arith.constant 0 : index
    %c0_4 = arith.constant 0 : index
    %c0_5 = arith.constant 0 : index
    %9 = vector.load %arg2[%c0_3, %c0_4, %c0_5] : memref<1x6x256xf32, #tpu.memory_space<vmem>>, vector<1x6x256xf32>
    %10 = vector.shape_cast %9 : vector<1x6x256xf32> to vector<6x256xf32>
    %c0_6 = arith.constant 0 : index
    %c0_7 = arith.constant 0 : index
    %c0_8 = arith.constant 0 : index
    %11 = vector.load %arg3[%c0_6, %c0_7, %c0_8] : memref<1x4x256xf32, #tpu.memory_space<vmem>>, vector<1x4x256xf32>
    %12 = vector.shape_cast %11 : vector<1x4x256xf32> to vector<4x256xf32>
    %cst = arith.constant dense<0.000000e+00> : vector<8x256xf32>
    %13 = tpu.matmul %2, %10, %cst {dimension_numbers = #tpu.dot_dimension_numbers<[1], [0], [0], [1], [0, 0, 1, 1], [], []>} : vector<8x6xf32>, vector<6x256xf32>, vector<8x256xf32> -> vector<8x256xf32>
    %14 = vector.broadcast %3 : vector<8x1xf32> to vector<8x256xf32>
    %15 = arith.addf %13, %14 : vector<8x256xf32>
    %cst_9 = arith.constant dense<0.000000e+00> : vector<8x256xf32>
    %16 = tpu.matmul %5, %12, %cst_9 {dimension_numbers = #tpu.dot_dimension_numbers<[1], [0], [0], [1], [0, 0, 1, 1], [], []>} : vector<8x4xf32>, vector<4x256xf32>, vector<8x256xf32> -> vector<8x256xf32>
    %17 = vector.broadcast %6 : vector<8x1xf32> to vector<8x256xf32>
    %18 = arith.addf %16, %17 : vector<8x256xf32>
    %19 = arith.addf %15, %18 : vector<8x256xf32>
    %cst_10 = arith.constant 0.000000e+00 : f32
    %20 = vector.broadcast %cst_10 : f32 to vector<8x256xf32>
    %21 = arith.cmpf oge, %19, %20 : vector<8x256xf32>
    %22 = vector.broadcast %4 : vector<8x1xf32> to vector<8x256xf32>
    %23 = arith.mulf %22, %19 : vector<8x256xf32>
    %24 = arith.select %21, %19, %23 : vector<8x256xi1>, vector<8x256xf32>
    %25 = vector.broadcast %7 : vector<8x1xf32> to vector<8x256xf32>
    %26 = arith.mulf %24, %25 : vector<8x256xf32>
    %cst_11 = arith.constant dense<0.000000e+00> : vector<256xf32>
    %27 = vector.multi_reduction <add>, %26, %cst_11 [0] : vector<8x256xf32> to vector<256xf32>
    %28 = vector.shape_cast %27 : vector<256xf32> to vector<1x256xf32>
    %29 = vector.broadcast %8 : vector<1x1xf32> to vector<1x256xf32>
    %30 = arith.addf %28, %29 : vector<1x256xf32>
    %31 = arith.negf %30 : vector<1x256xf32>
    %32 = math.exp %31 : vector<1x256xf32>
    %cst_12 = arith.constant 1.000000e+00 : f32
    %33 = vector.broadcast %cst_12 : f32 to vector<1x256xf32>
    %34 = arith.addf %33, %32 : vector<1x256xf32>
    %35 = arith.divf %33, %34 : vector<1x256xf32>
    %36 = vector.broadcast %35 : vector<1x256xf32> to vector<8x256xf32>
    %37 = arith.mulf %18, %36 : vector<8x256xf32>
    %c0_13 = arith.constant 0 : index
    %c0_14 = arith.constant 0 : index
    %c0_15 = arith.constant 0 : index
    %38 = vector.load %arg6[%c0_13, %c0_14, %c0_15] : memref<1x8x256xf32, #tpu.memory_space<vmem>>, vector<1x8x256xf32>
    %39 = vector.shape_cast %38 : vector<1x8x256xf32> to vector<8x256xf32>
    %40 = vector.shape_cast %37 : vector<8x256xf32> to vector<1x8x256xf32>
    tpu.vector_store %arg6[%c0_13, %c0_14, %c0_15], %40 {strides = array<i32>} : memref<1x8x256xf32, #tpu.memory_space<vmem>>, vector<1x8x256xf32>,
    return
  }
  func.func @transform_0(%arg0: i32, %arg1: i32) -> (i32, i32, i32) {
    %c0_i32 = arith.constant 0 : i32
    %c0_i32_0 = arith.constant 0 : i32
    return %arg0, %c0_i32, %arg1 : i32, i32, i32
  }
  func.func @transform_1(%arg0: i32, %arg1: i32) -> (i32, i32, i32) {
    %c0_i32 = arith.constant 0 : i32
    %c0_i32_0 = arith.constant 0 : i32
    return %arg0, %c0_i32, %arg1 : i32, i32, i32
  }
  func.func @transform_2(%arg0: i32, %arg1: i32) -> (i32, i32) {
    %c0_i32 = arith.constant 0 : i32
    %c0_i32_0 = arith.constant 0 : i32
    %c0_i32_1 = arith.constant 0 : i32
    return %c0_i32, %c0_i32_0 : i32, i32
  }
  func.func @transform_3(%arg0: i32, %arg1: i32) -> (i32, i32) {
    %c0_i32 = arith.constant 0 : i32
    %c0_i32_0 = arith.constant 0 : i32
    %c0_i32_1 = arith.constant 0 : i32
    return %c0_i32, %c0_i32_0 : i32, i32
  }
  func.func @transform_4(%arg0: i32, %arg1: i32) -> (i32, i32, i32) {
    %c0_i32 = arith.constant 0 : i32
    %c0_i32_0 = arith.constant 0 : i32
    return %arg0, %c0_i32, %arg1 : i32, i32, i32
  }
}

</mosaic_0001>

<bundles_post_ra>
// kernel: tpu_custom_call.1
= control target key start
LH: loop header
LB: loop body
LE: loop exit
PB: predicated region body
PF: predicated region fallthrough
CT: control target
= control target key end

     0   :  { %9 = vsyncpa [#allocation3], 0  ;;  %s944_s0 = inlined_call_operand.vmem [shape: f32[2,6,256], index: 0, kind: input, shape index: {}]   ;;  %s945_s1 = inlined_call_operand.vmem [shape: f32[2,4,256], index: 1, kind: input, shape index: {}]   ;;  %s946_s2 = inlined_call_operand.vmem [shape: f32[8,8], index: 2, kind: input, shape index: {}]   ;;  %s947_s3 = inlined_call_operand.vmem [shape: f32[8,7], index: 3, kind: input, shape index: {}]   ;;  %s948_s4 = inlined_call_operand.hbm [shape: f32[2,8,256], index: 4, kind: output, shape index: {}]  }
   0x1   :  { %11 = vsyncpa [#allocation3 + $0x1], 0  ;;  %s823_s15 = smov 0   ;;  %s825_s16 = smov 0  }
   0x2   :  { %s827_s17 = smov 0   ;;  %s829_s18 = smov 0  }
   0x3   :  { %s831_s19 = smov 0   ;;  %s833_s20 = smov 0  }
   0x4 LB: > { %s611_s21 = sadd.s32 4294967295, %s790_s20   ;;  %s612_s22 = sadd.s32 4294967294, %s790_s20   ;;  %s790_s20 = sphi %s833_s20, %s17_s20   ;;  %s786_s19 = sphi %s831_s19, %s955_s19   ;;  %s782_s18 = sphi %s829_s18, %s954_s18   ;;  %s778_s17 = sphi %s827_s17, %s953_s17   ;;  %s774_s16 = sphi %s825_s16, %s952_s16   ;;  %s770_s15 = sphi %s823_s15, %s951_s15  }
   0x5   : > { %s29_s23 = sadd.s32 1, %s786_s19  ;;  %s136_s24 = sadd.s32 1, %s778_s17 }
   0x6   : > { %p31_p0 = scmp.ge.s32.totalorder %s29_s23, 2  ;;  %p146_p1 = scmp.ne.s32.totalorder %s778_s17, %s774_s16 }
   0x7   : > { %p147_p2 = scmp.eq.s32.totalorder %s611_s21, 1  ;;  %p152_p3 = scmp.ne.s32.totalorder %s774_s16, %s770_s15 }
   0x8   : > { %s957_s23 = smov (%p31_p0, %s29_s23), 0  ;;  %p153_p5 = scmp.eq.s32.totalorder %s612_s22, 1 }
   0x9   : > { %p863_p4 = por %p147_p2, %p146_p1  ;;  %s131_s26 = ssub.s32 %s786_s19, %s957_s23 }
   0xa   : > { %p615_p6 = scmp.ge.s32.totalorder %s790_s20, 1  ;;  %p134_p7 = scmp.eq.s32.totalorder %s131_s26, 0 }
   0xb   : > { %p870_p8 = por %p153_p5, %p152_p3  ;;  %p203_p9 = scmp.lt.s32.totalorder %s790_s20, 3 }
   0xc   : > { %s876_s28 = scalar_select %p134_p7, %s778_s17, %s136_s24  }
   0xd   : > { %p204_p10 = pnand %p615_p6, %p203_p9 }
   0xe   : > { %p243_p11 = scmp.lt.s32.totalorder (!%p204_p10), %s782_s18, 1  ;;  %v792_v0 = vmov (!%p204_p10), 0.0   ;;  %v263_v1 = vld [vmem:[%s946_s2] sm:$0xff] (!%p204_p10)  ;;  %v793_v2 = vmov (!%p204_p10), 6   ;;  %v794_v3 = vmov (!%p204_p10), 7   ;;  %vm276_vm0 = vcmask (!%p204_p10), 1045504  }
   0xf   : > { %207 = sbr.rel (%p204_p10) target bundleno = 312 (0x138), region = 36  ;;  %347 = vmatprep.mubr.f32.mxu0 (!%p204_p10), %v792_v0  ;;  %433 = vmatprep.mubr.f32.mxu1 (!%p204_p10), %v792_v0  ;;  %vm273_vm1 = vcmask (!%p204_p10), 48128   ;;  %vm364_vm2 = vcmask (!%p204_p10), 1043456   ;;  %v264_v8 = vld [vmem:[%s947_s3] sm:$0xff] (!%p204_p10)  ;;  %v795_v9 = vmov (!%p204_p10), 4   ;;  %vm361_vm3 = vcmask (!%p204_p10), 31744  }
  0x10   : > { %697 = vset.pattern.permute.xlu0 (!%p204_p10), %v793_v2  ;;  %699 = vset.pattern.permute.xlu1 (!%p204_p10), %v794_v3  ;;  %v796_v10 = vmov (!%p204_p10), 5   ;;  %v488_v52 = vlaneseq (!%p204_p10)  ;;  %s239_s22 = sand.u32 (!%p204_p10), 1, %s774_s16   ;;  %s636_s26 = sshll.u32 (!%p204_p10), %s782_s18, 8 }
  0x11   : > { %270 = vperm.xlu0 (!%p204_p10), %697, %v263_v1   ;;  %445 = vperm.xlu1 (!%p204_p10), %699, %v263_v1   ;;  %s616_s24 = sshll.u32 (!%p204_p10), %s239_s22, 4  ;;  %s501_s8 = scalar_lea.sflag (!%p204_p10), [#allocation3], %s239_s22 }
  0x12   : > { %v489_v53 = vshrl.u32 (!%p204_p10), %v488_v52, 7 }
  0x14   : > { %v490_v54 = vsub.s32 (!%p204_p10), 0, %v489_v53 }
  0x15   : > { %698 = vset.pattern.permute.xlu0 (!%p204_p10), %v795_v9  ;;  %700 = vset.pattern.permute.xlu1 (!%p204_p10), %v796_v10 }
  0x16   : > { %s244_s29 = scalar_select %p243_p11, %s782_s18, 1  ;;  %356 = vperm.xlu0 %698, %v264_v8   ;;  %453 = vperm.xlu1 %700, %v264_v8  }
  0x17   : > { %s797_s18 = smov [#allocation2]  }
  0x18   : > { %s634_s6 = sshll.u32 %s244_s29, 4  ;;  %s635_s7 = sshll.u32 %s244_s29, 3 }
  0x19   : > { %s250_s10 = scalar_lea.vmem %s944_s0, %s634_s6  ;;  %s260_s13 = scalar_lea.vmem %s945_s1, %s635_s7 }
  0x1a   : > { %v266_v4 = vld [vmem:[%s250_s10 + $0x8] sm:$0x3f]  ;;  %v265_v5 = vld [vmem:[%s250_s10] sm:$0x3f]  ;;  %702 = vset.pattern.permute.xlu0 %v793_v2  ;;  %701 = vset.pattern.permute.xlu1 %v793_v2  ;;  %s241_s29 = scalar_lea.vmem [#allocation2], %s616_s24  ;;  %s897_s7 = scalar_lea.hbm %s948_s4, %s636_s26 }
  0x1b   : > { %v267_v6 = vld [vmem:[%s260_s13] sm:$0xff]  ;;  %621 = vmatprep.subr.msk.mxu0 %vm276_vm0, %v266_v4  ;;  %471 = vperm.xlu1 %701, %v264_v8   ;;  %s517_s30 = sshll.u32 %s241_s29, 4  ;;  %s716_s10 = sshll.u32 %s797_s18, 4  ;;  %s899_s30 = int_to_ptr.vmem [resolvable:$true] %s517_s30  ;;  %s717_s10 = int_to_ptr.vmem [resolvable:$false] %s716_s10 }
  0x1c   : > { %v360_v7 = vcombine.high %v267_v6, %v267_v6  ;;  %622 = vmatpush1.msk.msra.mxu0 %vm276_vm0, %v265_v5  ;;  %s712_s9 = scalar_lea.vmem %s899_s30, 256  ;;  %s718_s11 = scalar_lea.vmem %s717_s10, 512 }
  0x1d   : > { %623 = vmatmul.mubr.msk.f32.vlgmr.msra.gmra.mrb[0].mxu0 %vm273_vm1, %v263_v1  ;;  %p713_p12 = scmp.ne.s32.totalorder %s899_s30, %s712_s9  ;;  %p719_p1 = scmp.lt.s32.totalorder %s899_s30, %s717_s10 }
  0x1e   : > { %624 = vmatprep.subr.msk.mxu1 %vm364_vm2, %v360_v7  ;;  %p720_p2 = scmp.lt.s32.totalorder %s718_s11, %s712_s9 }
  0x1f   : > { %625 = vmatpush1.msk.msra.mxu1 %vm364_vm2, %v267_v6  ;;  %p714_p13 = pnand %p713_p12, %p863_p4 }
  0x20   : > { %626 = vmatmul.mubr.msk.f32.vlgmr.msra.gmra.mrb[0].mxu1 %vm361_vm3, %v264_v8  ;;  %p721_p3 = por %p720_p2, %p719_p1 }
  0x21   : > { %p715_p0 = pneg %p714_p13 }
  0x23   : > { %p722_p5 = pnand %p721_p3, %p715_p0 }
  0x90   : > { %v271_v11 = vpop.permute.xlu0 %270  ;;  %v446_v15 = vpop.permute.xlu1 %445 }
  0x95   : > { %v357_v13 = vpop.permute.xlu0 %356  ;;  %v454_v25 = vpop.permute.xlu1 %453 }
  0x9a   : > { %v472_v40 = vpop.permute.xlu1 %471 }
  0xf0   : > { %v349_v12 = vpop.f32.mrb[0].mxu0 }
  0xf1   : > { %v351_v14 = vpop.f32.mrb[1].mxu0  ;;  %v350_v17 = vadd.f32 %v349_v12, %v271_v11 }
  0xf2   : > { %v352_v20 = vadd.f32 %v351_v14, %v271_v11 }
  0xf3   : > { %v435_v16 = vpop.f32.mrb[0].mxu1 }
  0xf4   : > { %v436_v18 = vadd.f32 %v435_v16, %v357_v13  ;;  %v437_v19 = vpop.f32.mrb[1].mxu1 }
  0xf5   : > { %v438_v21 = vadd.f32 %v437_v19, %v357_v13 }
  0xf6   : > { %v440_v22 = vadd.f32 %v436_v18, %v350_v17 }
  0xf7   : > { %v441_v23 = vadd.f32 %v438_v21, %v352_v20 }
  0xf8   : > { %v448_v24 = vmul.f32 %v446_v15, %v440_v22  ;;  %vm442_vm4 = vcmp.ge.f32.partialorder %v440_v22, 0.0 }
  0xf9   : > { %v449_v26 = vmul.f32 %v446_v15, %v441_v23  ;;  %vm443_vm5 = vcmp.ge.f32.partialorder %v441_v23, 0.0 }
  0xfa   : > { %v450_v27 = vsel %vm442_vm4, %v440_v22, %v448_v24 }
  0xfb   : > { %v451_v28 = vsel %vm443_vm5, %v441_v23, %v449_v26  ;;  %v456_v29 = vmul.f32 %v454_v25, %v450_v27 }
  0xfc   : > { %v457_v30 = vmul.f32 %v454_v25, %v451_v28 }
  0xfd   : > { %v458_v31 = vrot.slane %v456_v29, 4 }
  0xfe   : > { %v464_v32 = vrot.slane %v457_v30, 4 }
  0xff   : > { %v459_v33 = vadd.f32 %v458_v31, %v456_v29 }
 0x100   : > { %v465_v34 = vadd.f32 %v464_v32, %v457_v30 }
 0x101   : > { %v460_v35 = vrot.slane %v459_v33, 2 }
 0x102   : > { %v466_v36 = vrot.slane %v465_v34, 2 }
 0x103   : > { %v461_v37 = vadd.f32 %v460_v35, %v459_v33 }
 0x104   : > { %v467_v38 = vadd.f32 %v466_v36, %v465_v34 }
 0x105   : > { %v462_v39 = vrot.slane %v461_v37, 1 }
 0x106   : > { %v468_v41 = vrot.slane %v467_v38, 1 }
 0x107   : > { %v463_v42 = vadd.f32 %v462_v39, %v461_v37 }
 0x108   : > { %v469_v43 = vadd.f32 %v468_v41, %v467_v38 }
 0x109   : > { %v474_v44 = vadd.f32 %v472_v40, %v463_v42 }
 0x10a   : > { %v475_v45 = vadd.f32 %v472_v40, %v469_v43 }
 0x10b   : > { %v627_v46 = vmul.f32 -1.442695, %v474_v44 }
 0x10c   : > { %v628_v47 = vmul.f32 -1.442695, %v475_v45 }
 0x10d   : > { %704 = vpow2.f32 %v627_v46 }
 0x10e   : > { %706 = vpow2.f32 %v628_v47 }
 0x117   : > { %v705_v48 = vpop.eup %704 }
 0x118   : > { %v707_v49 = vpop.eup %706  ;;  %v482_v50 = vadd.f32 1.0, %v705_v48 }
 0x119   : > { %v483_v51 = vadd.f32 1.0, %v707_v49 }
 0x11a   : > { %708 = vrcp.f32 %v482_v50 }
 0x11b   : > { %710 = vrcp.f32 %v483_v51 }
 0x124   : > { %v709_v55 = vpop.eup %708 }
 0x125   : > { %v711_v56 = vpop.eup %710  ;;  %v491_v57 = vrot.slane %v709_v55, %v490_v54 }
 0x126   : > { %v495_v58 = vrot.slane %v711_v56, %v490_v54 }
 0x127   : > { %v496_v59 = vmul.f32 %v491_v57, %v436_v18 }
 0x128   : > { %v497_v60 = vmul.f32 %v495_v58, %v438_v21 }
 0x129   : > { %498 = vst [vmem:[%s241_s29] sm:$0xff] %v496_v59 }
 0x12a   : > { %499 = vst [vmem:[%s241_s29 + $0x8] sm:$0xff] %v497_v60 }
 0x12b   : > { %725 = shalt.err (!%p722_p5)
}
 0x12c   : > { %s726_s12 = scalar_lea.hbm %s897_s7, 256  ;;  %s730_s21 = scalar_lea.hbm %s948_s4, 512 }
 0x12d   : > { %p727_p6 = scmp.ne.s32.totalorder %s897_s7, %s726_s12  ;;  %p731_p10 = scmp.lt.u32.totalorder %s897_s7, %s948_s4 }
 0x12e   : > { %p732_p11 = scmp.lt.u32.totalorder %s730_s21, %s726_s12  ;;  %p734_p13 = scmp.lt.u32.totalorder %s726_s12, %s897_s7 }
 0x12f   : > { %p728_p7 = pnand %p727_p6, %p863_p4 }
 0x130   : > { %p733_p12 = por %p732_p11, %p731_p10 }
 0x131   : > { %p729_p9 = pneg %p728_p7 }
 0x132   : > { %p735_p0 = por %p734_p13, %p733_p12 }
 0x134   : > { %p736_p1 = pnand %p735_p0, %p729_p9 }
 0x136   : > { %739 = shalt.err (!%p736_p1)
}
 0x137   : > { %637 = dma.vmem_to_hbm [thread:$0]  (%p863_p4), %s899_s30, 256, %s897_s7, %s501_s8  }
 0x138 PF: > { %p643_p2 = scmp.ge.s32.totalorder %s790_s20, 2  ;;  %s529_s26 = sand.u32 1, %s770_s15  }
 0x139   : > { %s530_s29 = scalar_lea.sflag [#allocation3], %s529_s26 }
 0x13a   : > { %p640_p3 = pnand %p643_p2, %p870_p8 }
 0x13c   : > { %765 = dma.done.wait (!%p640_p3), %s530_s29, 256  }
 0x13d   : > { %767 = vsyncadd (!%p640_p3), %s530_s29, 4294967040  ;;  %s17_s20 = sadd.s32 1, %s790_s20   ;;  %s951_s15 = smov %s774_s16 }
 0x13e   : > { %p14_p5 = scmp.ge.s32.totalorder %s17_s20, 4   ;;  %s952_s16 = smov %s778_s17 }
 0x13f   : > { %s953_s17 = smov %s876_s28  ;;  %s954_s18 = smov %s786_s19 }
 0x140   : > { %s955_s19 = smov %s957_s23  ;;  %16 = sbr.rel (!%p14_p5) target bundleno = 4 (0x4), region = 74 }
 0x147   :  { %535 = vsyncpa [#allocation3], 1 }
 0x148   :  { %537 = vsyncpa [#allocation3 + $0x1], 1 }

</bundles_post_ra>
